<compile_context>
chip_gen: v5e
topology: v5e:2x2
jax: 0.10.0
libtpu: 0.0.40
codegen_flags: <defaults>
</compile_context>

<pallas_src>
import functools

import jax
import jax.numpy as jnp
from jax.experimental import pallas as pl
from jax.experimental.pallas import tpu as pltpu

IN_FEATURES = 8
HIDDEN = 32
OUT_FEATURES = 1

# Lanes (batch elements) per grid step.  x tile = 8*TILE_B*4 B -> 8 MiB at
# 256K; double-buffered x+out tiles stay ~18 MiB, inside v7x's 64 MiB VMEM.
DEFAULT_TILE_B = 256 * 1024
# In-kernel sub-tile: keeps the (HIDDEN, chunk) f32 intermediate at ~64 KiB so
# VMEM temporaries do not scale with TILE_B.
CHUNK_B = 512
# Keep at least this many grid steps for large batches so the batch axis can
# split across both TensorCores on v7x and the pipeline has work to overlap.
TARGET_GRID_STEPS = 8


def _cdiv(a, b):
    return (a + b - 1) // b


def _round_up(n, m):
    return _cdiv(n, m) * m


def mlp_kernel(x_ref, w1_ref, b1_ref, w2_ref, b2_ref, o_ref, *, chunk, n_chunks):
    """relu(W1 @ x + b1) reduced against w2 for one lane-tile of the batch.

    x_ref : (IN_FEATURES, TILE_B) VMEM   batch on lanes (dense rows in HBM)
    w1_ref: (HIDDEN, IN_FEATURES) VMEM   grid-resident
    b1_ref: (HIDDEN, 1)           VMEM
    w2_ref: (HIDDEN, 1)           VMEM
    b2_ref: (1, 1)                SMEM scalar
    o_ref : (OUT_FEATURES, TILE_B) VMEM  lane-dense -> unmasked stores
    """
    w1 = w1_ref[...]
    b1 = b1_ref[...]
    w2 = w2_ref[...]
    b2 = b2_ref[0, 0]

    # Chunk the lane axis: the (HIDDEN, chunk) f32 activation stays a handful
    # of vregs regardless of TILE_B.  Chunk offsets are 128-aligned.
    @pl.loop(0, n_chunks)
    def _(c):
        start = pl.multiple_of(c * chunk, chunk)
        xs = x_ref[:, pl.ds(start, chunk)]                        # (8, chunk)
        # Layer 1 on the MXU: (32, 8) @ (8, chunk), f32 accumulate.
        h = jnp.dot(w1, xs, preferred_element_type=jnp.float32)   # (32, chunk)
        h = jnp.maximum(h + b1, 0.0)
        # Layer 2 has output width 1: VPU multiply + sublane (XLU) reduce keeps
        # the result lane-dense and avoids a pathological N=1 MXU matmul.
        out = jnp.sum(h * w2, axis=0, keepdims=True) + b2         # (1, chunk)
        o_ref[:, pl.ds(start, chunk)] = out.astype(o_ref.dtype)


def neural_network_forward_fmajor(x_fm, w1, b1, w2, b2, *, tile_b=DEFAULT_TILE_B):
    """Zero-wrapper-copy path: x_fm is feature-major (IN_FEATURES, B) -> (1, B).

    Moves exactly 32 B read + 4 B write of HBM per batch row.
    """
    assert x_fm.shape[0] == IN_FEATURES, "x_fm must be (IN_FEATURES, B)"
    B = x_fm.shape[1]

    # Lane tile: multiple of 128 (lowering requirement), capped so large
    # batches keep >= TARGET_GRID_STEPS independent grid steps.
    tile = min(max(int(tile_b), 128), _round_up(_cdiv(B, TARGET_GRID_STEPS), 128))
    tile = _round_up(max(tile, 128), 128)
    if tile > CHUNK_B:
        tile = _round_up(tile, CHUNK_B)   # CHUNK_B is a multiple of 128
        chunk = CHUNK_B
    else:
        chunk = tile
    n_chunks = tile // chunk

    # No padded copy: Pallas clips the ragged tail block (OOB output lanes are
    # dropped; garbage tail input lanes never contaminate valid lanes).
    grid = (_cdiv(B, tile),)

    b1_col = b1.reshape(HIDDEN, 1)
    w2_col = w2.reshape(HIDDEN, OUT_FEATURES)   # (32, 1)
    b2_s = b2.reshape(1, 1)

    x_tile_bytes = tile * IN_FEATURES * 4
    out_tile_bytes = tile * OUT_FEATURES * 4
    vmem_limit = 2 * (x_tile_bytes + out_tile_bytes) + (16 << 20)

    param_bytes = (HIDDEN * IN_FEATURES + HIDDEN
                   + OUT_FEATURES * HIDDEN + OUT_FEATURES) * 4
    cost = pl.CostEstimate(
        flops=2 * B * (IN_FEATURES * HIDDEN + HIDDEN * OUT_FEATURES),
        transcendentals=0,
        bytes_accessed=B * (IN_FEATURES + OUT_FEATURES) * 4 + param_bytes,
    )

    kernel = functools.partial(mlp_kernel, chunk=chunk, n_chunks=n_chunks)

    return pl.pallas_call(
        kernel,
        out_shape=jax.ShapeDtypeStruct((OUT_FEATURES, B), jnp.float32),
        grid_spec=pltpu.PrefetchScalarGridSpec(
            num_scalar_prefetch=0,
            grid=grid,
            in_specs=[
                # x: tiled along batch lanes, double-buffered by the pipeline.
                pl.BlockSpec((IN_FEATURES, tile), lambda i: (0, i)),
                # Weights/biases: constant block index -> stay VMEM-resident.
                pl.BlockSpec((HIDDEN, IN_FEATURES), lambda i: (0, 0)),
                pl.BlockSpec((HIDDEN, 1), lambda i: (0, 0)),
                pl.BlockSpec((HIDDEN, 1), lambda i: (0, 0)),
                # b2: single 4-byte scalar in SMEM.
                pl.BlockSpec(memory_space=pltpu.MemorySpace.SMEM),
            ],
            out_specs=pl.BlockSpec((OUT_FEATURES, tile), lambda i: (0, i)),
        ),
        compiler_params=pltpu.CompilerParams(
            dimension_semantics=("parallel",),
            vmem_limit_bytes=int(vmem_limit),
        ),
        cost_estimate=cost,
    )(x_fm, w1, b1_col, w2_col, b2_s)


def neural_network_forward(x, w1, b1, w2, b2, *, tile_b=DEFAULT_TILE_B):
    """PyTorch-layout forward pass: x (B, 8) float32 -> (B, 1) float32.

    Keeps exactly one wrapper copy (the (B,8)->(8,B) relayout); producers that
    can emit the feature-major layout should call
    neural_network_forward_fmajor directly and skip it.
    """
    B = x.shape[0]
    out_fm = neural_network_forward_fmajor(x.T, w1, b1, w2, b2, tile_b=tile_b)
    return out_fm.reshape(B, OUT_FEATURES)      # (1, B) -> (B, 1): contiguous, free


def init_params(key):
    """Deterministic init matching PyTorch nn.Linear shapes/init."""
    k1, k2, k3, k4 = jax.random.split(key, 4)
    bound1 = 1.0 / jnp.sqrt(jnp.float32(IN_FEATURES))
    bound2 = 1.0 / jnp.sqrt(jnp.float32(HIDDEN))
    w1 = jax.random.uniform(k1, (HIDDEN, IN_FEATURES), jnp.float32, -bound1, bound1)
    b1 = jax.random.uniform(k2, (HIDDEN,), jnp.float32, -bound1, bound1)
    w2 = jax.random.uniform(k3, (OUT_FEATURES, HIDDEN), jnp.float32, -bound2, bound2)
    b2 = jax.random.uniform(k4, (OUT_FEATURES,), jnp.float32, -bound2, bound2)
    return w1, b1, w2, b2


def reference_forward(x, w1, b1, w2, b2):
    h = jnp.maximum(x @ w1.T + b1, 0.0)
    return h @ w2.T + b2


if __name__ == "__main__":
    key = jax.random.PRNGKey(0)
    kx, kx2, kx3, kp = jax.random.split(key, 4)

    w1, b1, w2, b2 = init_params(kp)

    # Small batch: single (partial) tile, single chunk.
    batch = 8
    x = jax.random.normal(kx, (batch, IN_FEATURES), jnp.float32)
    out = jax.block_until_ready(neural_network_forward(x, w1, b1, w2, b2))
    ref = reference_forward(x, w1, b1, w2, b2)
    assert out.shape == (batch, OUT_FEATURES)
    assert jnp.allclose(out, ref, atol=1e-5, rtol=1e-5), "mismatch (batch=8)"

    # Ragged batch with a small forced tile: multi-step grid + clipped tail
    # block (no padded copy anywhere).
    batch2 = 300
    x2 = jax.random.normal(kx2, (batch2, IN_FEATURES), jnp.float32)
    out2 = jax.block_until_ready(
        neural_network_forward(x2, w1, b1, w2, b2, tile_b=128))
    ref2 = reference_forward(x2, w1, b1, w2, b2)
    assert out2.shape == (batch2, OUT_FEATURES)
    assert jnp.allclose(out2, ref2, atol=1e-5, rtol=1e-5), "mismatch (batch=300)"

    # Larger batch with default tiling: exercises the >=8-step grid target,
    # the multi-chunk in-kernel loop, and the zero-copy feature-major entry.
    batch3 = 8192
    x3 = jax.random.normal(kx3, (batch3, IN_FEATURES), jnp.float32)
    out3 = jax.block_until_ready(neural_network_forward(x3, w1, b1, w2, b2))
    ref3 = reference_forward(x3, w1, b1, w2, b2)
    assert out3.shape == (batch3, OUT_FEATURES)
    assert jnp.allclose(out3, ref3, atol=1e-5, rtol=1e-5), "mismatch (batch=8192)"

    out3_fm = jax.block_until_ready(
        neural_network_forward_fmajor(x3.T, w1, b1, w2, b2))
    assert out3_fm.shape == (OUT_FEATURES, batch3)
    assert jnp.allclose(out3_fm.reshape(batch3, 1), ref3, atol=1e-5, rtol=1e-5), \
        "mismatch (fmajor path)"

    print("KERNEL_OK")
</pallas_src>

<mosaic_0001>
module attributes {stable_mosaic.version = 11 : i64} {
  func.func @mlp_kernel(%arg0: i32, %arg1: memref<8x128xf32, #tpu.memory_space<vmem>>, %arg2: memref<32x8xf32, #tpu.memory_space<vmem>>, %arg3: memref<32x1xf32, #tpu.memory_space<vmem>>, %arg4: memref<32x1xf32, #tpu.memory_space<vmem>>, %arg5: memref<1x1xf32, #tpu.memory_space<smem>>, %arg6: memref<1x128xf32, #tpu.memory_space<vmem>>) attributes {dimension_semantics = [#tpu.dimension_semantics<parallel>], iteration_bounds = array<i64: 1>, scalar_prefetch = 0 : i64, scratch_operands = 0 : i64, tpu.core_type = #tpu.core_type<tc>, window_params = [{transform_indices = @transform_0, window_bounds = array<i64: 8, 128>}, {pipeline_mode = #tpu.pipeline_mode<synchronous>, transform_indices = @transform_1, window_bounds = array<i64: 32, 8>}, {pipeline_mode = #tpu.pipeline_mode<synchronous>, transform_indices = @transform_2, window_bounds = array<i64: 32, 1>}, {pipeline_mode = #tpu.pipeline_mode<synchronous>, transform_indices = @transform_3, window_bounds = array<i64: 32, 1>}, {transform_indices = @transform_4, window_bounds = array<i64: 1, 1>}, {transform_indices = @transform_5, window_bounds = array<i64: 1, 128>}]} {
    %c0 = arith.constant 0 : index
    %c0_0 = arith.constant 0 : index
    %0 = vector.load %arg2[%c0, %c0_0] : memref<32x8xf32, #tpu.memory_space<vmem>>, vector<32x8xf32>
    %c0_1 = arith.constant 0 : index
    %c0_2 = arith.constant 0 : index
    %1 = vector.load %arg3[%c0_1, %c0_2] : memref<32x1xf32, #tpu.memory_space<vmem>>, vector<32x1xf32>
    %c0_3 = arith.constant 0 : index
    %c0_4 = arith.constant 0 : index
    %2 = vector.load %arg4[%c0_3, %c0_4] : memref<32x1xf32, #tpu.memory_space<vmem>>, vector<32x1xf32>
    %c0_5 = arith.constant 0 : index
    %c0_6 = arith.constant 0 : index
    %3 = memref.load %arg5[%c0_5, %c0_6] : memref<1x1xf32, #tpu.memory_space<smem>>
    %c0_i32 = arith.constant 0 : i32
    %c1_i32 = arith.constant 1 : i32
    %4 = arith.muli %c0_i32, %c1_i32 : i32
    %c0_i32_7 = arith.constant 0 : i32
    %5 = arith.addi %c0_i32_7, %4 : i32
    %c128_i32 = arith.constant 128 : i32
    %6 = arith.muli %5, %c128_i32 : i32
    %7 = tpu.assume_multiple %6, 128 : i32
    %c0_8 = arith.constant 0 : index
    %8 = arith.index_cast %7 : i32 to index
    %9 = vector.load %arg1[%c0_8, %8] : memref<8x128xf32, #tpu.memory_space<vmem>>, vector<8x128xf32>
    %cst = arith.constant dense<0.000000e+00> : vector<32x128xf32>
    %10 = tpu.matmul %0, %9, %cst {dimension_numbers = #tpu.dot_dimension_numbers<[1], [0], [0], [1], [0, 0, 1, 1], [], []>} : vector<32x8xf32>, vector<8x128xf32>, vector<32x128xf32> -> vector<32x128xf32>
    %11 = vector.broadcast %1 : vector<32x1xf32> to vector<32x128xf32>
    %12 = arith.addf %10, %11 : vector<32x128xf32>
    %cst_9 = arith.constant 0.000000e+00 : f32
    %13 = vector.broadcast %cst_9 : f32 to vector<32x128xf32>
    %14 = arith.maximumf %12, %13 : vector<32x128xf32>
    %15 = vector.broadcast %2 : vector<32x1xf32> to vector<32x128xf32>
    %16 = arith.mulf %14, %15 : vector<32x128xf32>
    %cst_10 = arith.constant dense<0.000000e+00> : vector<128xf32>
    %17 = vector.multi_reduction <add>, %16, %cst_10 [0] : vector<32x128xf32> to vector<128xf32>
    %18 = vector.shape_cast %17 : vector<128xf32> to vector<1x128xf32>
    %19 = vector.broadcast %3 : f32 to vector<1x128xf32>
    %20 = arith.addf %18, %19 : vector<1x128xf32>
    %c0_11 = arith.constant 0 : index
    %21 = arith.index_cast %7 : i32 to index
    %22 = vector.load %arg6[%c0_11, %21] : memref<1x128xf32, #tpu.memory_space<vmem>>, vector<1x128xf32>
    tpu.vector_store %arg6[%c0_11, %21], %20 {strides = array<i32>} : memref<1x128xf32, #tpu.memory_space<vmem>>, vector<1x128xf32>,
    %c1_i32_12 = arith.constant 1 : i32
    return
  }
  func.func @transform_0(%arg0: i32) -> (i32, i32) {
    %c0_i32 = arith.constant 0 : i32
    %c0_i32_0 = arith.constant 0 : i32
    return %c0_i32, %arg0 : i32, i32
  }
  func.func @transform_1(%arg0: i32) -> (i32, i32) {
    %c0_i32 = arith.constant 0 : i32
    %c0_i32_0 = arith.constant 0 : i32
    %c0_i32_1 = arith.constant 0 : i32
    return %c0_i32, %c0_i32_0 : i32, i32
  }
  func.func @transform_2(%arg0: i32) -> (i32, i32) {
    %c0_i32 = arith.constant 0 : i32
    %c0_i32_0 = arith.constant 0 : i32
    %c0_i32_1 = arith.constant 0 : i32
    return %c0_i32, %c0_i32_0 : i32, i32
  }
  func.func @transform_3(%arg0: i32) -> (i32, i32) {
    %c0_i32 = arith.constant 0 : i32
    %c0_i32_0 = arith.constant 0 : i32
    %c0_i32_1 = arith.constant 0 : i32
    return %c0_i32, %c0_i32_0 : i32, i32
  }
  func.func @transform_4(%arg0: i32) -> (i32, i32) {
    %c0_i32 = arith.constant 0 : i32
    %c0_i32_0 = arith.constant 0 : i32
    %c0_i32_1 = arith.constant 0 : i32
    return %c0_i32, %c0_i32_0 : i32, i32
  }
  func.func @transform_5(%arg0: i32) -> (i32, i32) {
    %c0_i32 = arith.constant 0 : i32
    %c0_i32_0 = arith.constant 0 : i32
    return %c0_i32, %arg0 : i32, i32
  }
}

</mosaic_0001>

<bundles_post_ra>
// kernel: tpu_custom_call.1
= control target key start
LH: loop header
LB: loop body
LE: loop exit
PB: predicated region body
PF: predicated region fallthrough
CT: control target
= control target key end

     0   :  { %v192_v1 = vmov 0   ;;  %vm56_vm0 = vcmask 64512   ;;  %s269_s0 = inlined_call_operand.vmem [shape: f32[8,8], index: 0, kind: input, shape index: {}]   ;;  %s270_s1 = inlined_call_operand.vmem [shape: f32[32,8], index: 1, kind: input, shape index: {}]   ;;  %s271_s2 = inlined_call_operand.vmem [shape: f32[32,1], index: 2, kind: input, shape index: {}]   ;;  %s272_s3 = inlined_call_operand.vmem [shape: f32[32,1], index: 3, kind: input, shape index: {}]   ;;  %s273_s4 = inlined_call_operand.<no memory space> [shape: f32[1,1], index: 4, kind: input, shape index: {}]   ;;  %s274_s5 = inlined_call_operand.hbm [shape: f32[1,8], index: 5, kind: output, shape index: {}]  }
   0x1   :  { %v35_v0 = vld [vmem:[%s269_s0] sm:$0xff]  ;;  %164 = vset.pattern.permute.xlu1 %v192_v1  ;;  %163 = vset.pattern.permute.xlu0 %v192_v1  ;;  %v28_v2 = vld [vmem:[%s271_s2 + $0x10] sm:$0xff]  ;;  %v23_v5 = vld [vmem:[%s270_s1 + $0x8] sm:$0xff] }
   0x2   :  { %v26_v3 = vld [vmem:[%s271_s2] sm:$0xff]  ;;  %84 = vmatpush.msra.mxu0 %v35_v0  ;;  %158 = vmatpush.msra.mxu1 %v35_v0  ;;  %v24_v6 = vld [vmem:[%s270_s1 + $0x10] sm:$0xff]  ;;  %v25_v7 = vld [vmem:[%s270_s1 + $0x18] sm:$0xff] }
   0x3   :  { %v22_v4 = vld [vmem:[%s270_s1] sm:$0xff]  ;;  %159 = vmatpush.msra.mxu2 %v35_v0  ;;  %160 = vmatpush.msra.mxu3 %v35_v0 }
   0x4   :  { %48 = vperm.xlu1 %164, %v28_v2   ;;  %38 = vperm.xlu0 %163, %v26_v3  }
   0x5   :  { %11 = vsyncpa [#allocation4], 0  ;;  %154 = vmatmul.msk.f32.vlgmr.msra.gmra.mxu0 %vm56_vm0, %v22_v4  ;;  %155 = vmatmul.msk.f32.vlgmr.msra.gmra.mxu1 %vm56_vm0, %v23_v5  ;;  %v30_v8 = vld [vmem:[%s272_s3] sm:$0xff]  ;;  %v29_v9 = vld [vmem:[%s271_s2 + $0x18] sm:$0xff]  ;;  %v135_v46 = vstv %s273_s4  ;;  %s193_s17 = smov [#allocation3]   ;;  %s145_s21 = sshll.u32 %s274_s5, 4  ;;  %s146_s21 = int_to_ptr.hbm [resolvable:$true] %s145_s21 }
   0x6   :  { %156 = vmatmul.msk.f32.vlgmr.msra.gmra.mxu2 %vm56_vm0, %v24_v6  ;;  %157 = vmatmul.msk.f32.vlgmr.msra.gmra.mxu3 %vm56_vm0, %v25_v7  ;;  %v27_v10 = vld [vmem:[%s271_s2 + $0x8] sm:$0xff]  ;;  %v33_v12 = vld [vmem:[%s272_s3 + $0x18] sm:$0xff]  ;;  %v32_v13 = vld [vmem:[%s272_s3 + $0x10] sm:$0xff]  ;;  %s143_s18 = sshll.u32 %s193_s17, 4  ;;  %s144_s18 = int_to_ptr.vmem [resolvable:$true] %s143_s18 }
   0x7   :  { %165 = vset.pattern.permute.xlu2 %v192_v1  ;;  %v31_v11 = vld [vmem:[%s272_s3 + $0x8] sm:$0xff] }
   0x8   :  { %104 = vperm.xlu2 %165, %v30_v8  }
   0xc   :  { %53 = vperm.xlu1 %164, %v29_v9   ;;  %43 = vperm.xlu0 %163, %v27_v10  }
  0x10   :  { %109 = vperm.xlu2 %165, %v31_v11  }
  0x14   :  { %119 = vperm.xlu1 %164, %v33_v12   ;;  %114 = vperm.xlu0 %163, %v32_v13  }
  0x62   :  { %v105_v16 = vpop.permute.xlu2 %104 }
  0x6a   :  { %v110_v25 = vpop.permute.xlu2 %109 }
  0x76   :  { %v39_v14 = vpop.permute.xlu0 %38  ;;  %v49_v15 = vpop.permute.xlu1 %48 }
  0x7e   :  { %v44_v17 = vpop.permute.xlu0 %43  ;;  %v54_v22 = vpop.permute.xlu1 %53 }
  0x82   :  { %v86_v18 = vpop.f32.mrf.mxu0  ;;  %v89_v19 = vpop.f32.mrf.mxu1 }
  0x83   :  { %v87_v20 = vadd.f32 %v86_v18, %v39_v14  ;;  %v90_v21 = vadd.f32 %v89_v19, %v44_v17 }
  0x85   :  { %v98_v23 = vmax.f32 %v87_v20, 0.0  ;;  %v99_v24 = vmax.f32 %v90_v21, 0.0 }
  0x86   :  { %v115_v34 = vpop.permute.xlu0 %114  ;;  %v120_v37 = vpop.permute.xlu1 %119 }
  0x87   :  { %v122_v28 = vmul.f32 %v105_v16, %v98_v23  ;;  %v123_v29 = vmul.f32 %v110_v25, %v99_v24 }
  0x89   :  { %v92_v26 = vpop.f32.mrf.mxu2  ;;  %v95_v27 = vpop.f32.mrf.mxu3  ;;  %v126_v35 = vadd.f32 %v123_v29, %v122_v28 }
  0x8a   :  { %v93_v30 = vadd.f32 %v92_v26, %v49_v15  ;;  %v96_v31 = vadd.f32 %v95_v27, %v54_v22 }
  0x8c   :  { %v100_v32 = vmax.f32 %v93_v30, 0.0  ;;  %v101_v33 = vmax.f32 %v96_v31, 0.0 }
  0x8e   :  { %v124_v36 = vmul.f32 %v115_v34, %v100_v32  ;;  %v125_v39 = vmul.f32 %v120_v37, %v101_v33 }
  0x90   :  { %v127_v38 = vadd.f32 %v126_v35, %v124_v36 }
  0x92   :  { %v128_v40 = vadd.f32 %v127_v38, %v125_v39 }
  0x94   :  { %v129_v41 = vrot.slane %v128_v40, 4 }
  0x96   :  { %v130_v42 = vadd.f32 %v129_v41, %v128_v40 }
  0x98   :  { %v131_v43 = vrot.slane %v130_v42, 2 }
  0x9a   :  { %v132_v44 = vadd.f32 %v131_v43, %v130_v42 }
  0x9c   :  { %v133_v45 = vrot.slane %v132_v44, 1 }
  0x9e   :  { %v134_v47 = vadd.f32 %v133_v45, %v132_v44 }
  0xa0   :  { %v136_v48 = vadd.f32 %v135_v46, %v134_v47 }
  0xa2   :  { %137 = vst [vmem:[#allocation3] sm:$0x1] %v136_v48 }
  0xa3   :  { %148 = dma.vmem_to_hbm [thread:$0]  %s144_s18, 16, %s146_s21, [#allocation4]  }
  0xa4   :  { %190 = dma.done.wait [#allocation4], 16  }
  0xa5   :  { %191 = vsyncadd [#allocation4], 4294967280 }
  0xa6   :  { %153 = vsyncpa [#allocation4], 1 }

</bundles_post_ra>
